<compile_context>
chip_gen: v7x
topology: tpu7x:2x2x1
jax: 0.10.0
libtpu: 0.0.40
codegen_flags: <defaults>
</compile_context>

<pallas_src>
import jax
import jax.numpy as jnp
from jax.experimental import pallas as pl
from jax.experimental.pallas import tpu as pltpu


def _flatten_copy_kernel(x_ref, o_ref, sem):
    # x_ref / o_ref are raw HBM refs (memory_space=pl.ANY).  Single
    # HBM->HBM DMA; no VMEM staging, no per-tile pipeline overhead.
    cp = pltpu.make_async_copy(x_ref, o_ref, sem)
    cp.start()
    cp.wait()


def conv_flatten_net(x):
    """Equivalent of TorchConvFlattenNet.forward: torch.flatten(x, 1)."""
    n = x.shape[0]
    flat = 1
    for d in x.shape[1:]:
        flat *= d

    # Free (metadata-only) reshape in the wrapper — this IS torch.flatten(x,1)
    # for a contiguous tensor.  The DMA below only materializes it into a
    # fresh output buffer.
    x2 = x.reshape(n, flat)

    itemsize = jnp.dtype(x.dtype).itemsize
    return pl.pallas_call(
        _flatten_copy_kernel,
        out_shape=jax.ShapeDtypeStruct((n, flat), x.dtype),
        in_specs=[pl.BlockSpec(memory_space=pl.ANY)],
        out_specs=pl.BlockSpec(memory_space=pl.ANY),
        scratch_shapes=[pltpu.SemaphoreType.DMA],
        cost_estimate=pl.CostEstimate(
            flops=0,
            transcendentals=0,
            bytes_accessed=2 * n * flat * itemsize,
        ),
    )(x2)


if __name__ == "__main__":
    key = jax.random.PRNGKey(0)
    # Small NCHW input consistent with a conv-style network input.
    x = jax.random.normal(key, (2, 4, 16, 16), dtype=jnp.float32)

    out = conv_flatten_net(x)
    out = jax.block_until_ready(out)

    # Verify against the pure-JAX reference (torch.flatten(x, 1) semantics).
    ref = x.reshape(x.shape[0], -1)
    assert out.shape == ref.shape, (out.shape, ref.shape)
    assert jnp.array_equal(out, ref), "mismatch vs reference flatten"

    print("KERNEL_OK")
</pallas_src>

<mosaic_0001>
module attributes {stable_mosaic.version = 11 : i64} {
  func.func @_flatten_copy_kernel(%arg0: memref<2x1024xf32, #tpu.memory_space<any>>, %arg1: memref<2x1024xf32, #tpu.memory_space<any>>, %arg2: memref<!tpu.dma_semaphore, #tpu.memory_space<semaphore_mem>>) attributes {dimension_semantics = [], scalar_prefetch = 0 : i64, scratch_operands = 1 : i64, tpu.core_type = #tpu.core_type<tc>} {
    tpu.enqueue_dma source(%arg0 : memref<2x1024xf32, #tpu.memory_space<any>>) target(%arg1 : memref<2x1024xf32, #tpu.memory_space<any>>) target_semaphore(%arg2 : memref<!tpu.dma_semaphore, #tpu.memory_space<semaphore_mem>>)
    tpu.wait_dma2 semaphore(%arg2 : memref<!tpu.dma_semaphore, #tpu.memory_space<semaphore_mem>>) src(%arg0 : memref<2x1024xf32, #tpu.memory_space<any>>) dst(%arg1 : memref<2x1024xf32, #tpu.memory_space<any>>)
    return
  }
}

</mosaic_0001>

<bundles_post_ra>
// kernel: tpu_custom_call.1
= control target key start
LH: loop header
LB: loop body
LE: loop exit
PB: predicated region body
PF: predicated region fallthrough
CT: control target
= control target key end

     0   :  { %s35_s6 = smov [#allocation2]   ;;  %s36_s7 = smov [#allocation3]   ;;  %s54_s0 = inlined_call_operand.hbm [shape: f32[2,1024], index: 0, kind: input, shape index: {}]   ;;  %s55_s1 = inlined_call_operand.hbm [shape: f32[2,1024], index: 1, kind: output, shape index: {}]  }
   0x1   :  { %s37_s8 = smov 0  }
   0x2   :  { %18 = dma.general %s54_s0, 256, %s55_s1, %s35_s6, %s36_s7, [#allocation4], %s37_s8, 0  }
   0x3   :  { %33 = dma.done.wait [#allocation2], 256 }
   0x4   :  { %34 = vsyncadd [#allocation2], 4294967040 }
   0x5   :  { %23 = vsyncmov [#allocation2] }
   0x8   :  { %s24_s13 = vpop.sfrf %23 }
   0x9   :  { %p29_p0 = scmp.ne.s32.totalorder %s24_s13, 0 }
   0xb   :  { %28 = shalt.err (%p29_p0)  }

</bundles_post_ra>
